<compile_context>
chip_gen: v7x
topology: tpu7x:2x2x1
jax: 0.10.0
libtpu: 0.0.40
codegen_flags: <defaults>
</compile_context>

<pallas_src>
import jax
import jax.numpy as jnp
from jax.experimental import pallas as pl
from jax.experimental.pallas import tpu as pltpu


HIDDEN = 512


def _dqn_kernel(x_ref, w1_ref, b1_ref, w2_ref, b2_ref, w3_ref, b3_ref,
                w4_ref, b4_ref, o_ref):
    # Layer 1: Linear(state_dim -> 512) + ReLU   (bf16 x bf16 -> f32 acc)
    h = jnp.dot(x_ref[...].astype(jnp.bfloat16), w1_ref[...],
                preferred_element_type=jnp.float32)
    h = jnp.maximum(h + b1_ref[...], 0.0)
    # Layer 2: Linear(512 -> 512) + ReLU
    h = jnp.dot(h.astype(jnp.bfloat16), w2_ref[...],
                preferred_element_type=jnp.float32)
    h = jnp.maximum(h + b2_ref[...], 0.0)
    # Layer 3: Linear(512 -> 512) + ReLU
    h = jnp.dot(h.astype(jnp.bfloat16), w3_ref[...],
                preferred_element_type=jnp.float32)
    h = jnp.maximum(h + b3_ref[...], 0.0)
    # Layer 4: Linear(512 -> act_dim), no activation
    q = jnp.dot(h.astype(jnp.bfloat16), w4_ref[...],
                preferred_element_type=jnp.float32)
    o_ref[...] = (q + b4_ref[...]).astype(o_ref.dtype)


def dqn_forward(obs, params, *, tm=256):
    """obs: (B, state_dim) f32.  params: dict with bf16 weights (in,out) and f32 biases (1,out)."""
    w1, b1, w2, b2, w3, b3, w4, b4 = (
        params["w1"], params["b1"], params["w2"], params["b2"],
        params["w3"], params["b3"], params["w4"], params["b4"])

    B, state_dim = obs.shape
    act_dim = w4.shape[1]

    # Batch tile: TM=256 fills the v6e/v7x MXU M dimension; for small batches
    # use the full batch as a single block (no padding copy needed — a block
    # equal to the full array shape is legal).  Ragged last tiles are handled
    # by Pallas masked writes.
    TM = B if B <= tm else tm
    grid = (pl.cdiv(B, TM),)

    # Weights/biases: constant block index -> fetched once, VMEM-resident
    # across all batch tiles.
    resident = lambda arr: pl.BlockSpec(arr.shape, lambda i: (0, 0))

    out = pl.pallas_call(
        _dqn_kernel,
        out_shape=jax.ShapeDtypeStruct((B, act_dim), jnp.float32),
        grid=grid,
        in_specs=[
            pl.BlockSpec((TM, state_dim), lambda i: (i, 0)),
            resident(w1), resident(b1),
            resident(w2), resident(b2),
            resident(w3), resident(b3),
            resident(w4), resident(b4),
        ],
        out_specs=pl.BlockSpec((TM, act_dim), lambda i: (i, 0)),
        compiler_params=pltpu.CompilerParams(
            dimension_semantics=("parallel",)),
    )(obs, w1, b1, w2, b2, w3, b3, w4, b4)

    return out


def init_params(key, state_dim, act_dim):
    """Deterministic init mimicking PyTorch nn.Linear default (U[-1/sqrt(fan_in), +]).

    Weights are stored already transposed as (in_dim, out_dim) and cast to bf16
    (HBM-bandwidth win); biases stay f32 with shape (1, out_dim).
    """
    dims = [(state_dim, HIDDEN), (HIDDEN, HIDDEN), (HIDDEN, HIDDEN), (HIDDEN, act_dim)]
    params = {}
    keys = jax.random.split(key, 2 * len(dims))
    for i, (fan_in, fan_out) in enumerate(dims):
        bound = 1.0 / (fan_in ** 0.5)
        w = jax.random.uniform(keys[2 * i], (fan_in, fan_out), jnp.float32, -bound, bound)
        params[f"w{i+1}"] = w.astype(jnp.bfloat16)
        params[f"b{i+1}"] = jax.random.uniform(
            keys[2 * i + 1], (1, fan_out), jnp.float32, -bound, bound)
    return params


def dqn_reference(obs, params):
    """Pure-JAX reference using the same bf16-weight / f32-accumulate math."""
    h = obs
    for i in (1, 2, 3):
        h = jnp.dot(h.astype(jnp.bfloat16), params[f"w{i}"],
                    preferred_element_type=jnp.float32) + params[f"b{i}"]
        h = jnp.maximum(h, 0.0)
    q = jnp.dot(h.astype(jnp.bfloat16), params["w4"],
                preferred_element_type=jnp.float32) + params["b4"]
    return q


if __name__ == "__main__":
    key = jax.random.PRNGKey(0)
    state_dim, act_dim, batch = 16, 8, 2

    k_obs, k_params = jax.random.split(key)
    obs = jax.random.normal(k_obs, (batch, state_dim), jnp.float32)
    params = init_params(k_params, state_dim, act_dim)

    q = dqn_forward(obs, params)
    q = jax.block_until_ready(q)

    q_ref = dqn_reference(obs, params)
    assert q.shape == (batch, act_dim)
    assert jnp.allclose(q, q_ref, atol=2e-2, rtol=2e-2), "mismatch vs JAX reference"

    print("KERNEL_OK")
</pallas_src>

<mosaic_0001>
module attributes {stable_mosaic.version = 11 : i64} {
  func.func @_dqn_kernel(%arg0: i32, %arg1: memref<2x16xf32, #tpu.memory_space<vmem>>, %arg2: memref<16x512xbf16, #tpu.memory_space<vmem>>, %arg3: memref<1x512xf32, #tpu.memory_space<vmem>>, %arg4: memref<512x512xbf16, #tpu.memory_space<vmem>>, %arg5: memref<1x512xf32, #tpu.memory_space<vmem>>, %arg6: memref<512x512xbf16, #tpu.memory_space<vmem>>, %arg7: memref<1x512xf32, #tpu.memory_space<vmem>>, %arg8: memref<512x8xbf16, #tpu.memory_space<vmem>>, %arg9: memref<1x8xf32, #tpu.memory_space<vmem>>, %arg10: memref<2x8xf32, #tpu.memory_space<vmem>>) attributes {dimension_semantics = [#tpu.dimension_semantics<parallel>], iteration_bounds = array<i64: 1>, scalar_prefetch = 0 : i64, scratch_operands = 0 : i64, tpu.core_type = #tpu.core_type<tc>, window_params = [{transform_indices = @transform_0, window_bounds = array<i64: 2, 16>}, {pipeline_mode = #tpu.pipeline_mode<synchronous>, transform_indices = @transform_1, window_bounds = array<i64: 16, 512>}, {pipeline_mode = #tpu.pipeline_mode<synchronous>, transform_indices = @transform_2, window_bounds = array<i64: 1, 512>}, {pipeline_mode = #tpu.pipeline_mode<synchronous>, transform_indices = @transform_3, window_bounds = array<i64: 512, 512>}, {pipeline_mode = #tpu.pipeline_mode<synchronous>, transform_indices = @transform_4, window_bounds = array<i64: 1, 512>}, {pipeline_mode = #tpu.pipeline_mode<synchronous>, transform_indices = @transform_5, window_bounds = array<i64: 512, 512>}, {pipeline_mode = #tpu.pipeline_mode<synchronous>, transform_indices = @transform_6, window_bounds = array<i64: 1, 512>}, {pipeline_mode = #tpu.pipeline_mode<synchronous>, transform_indices = @transform_7, window_bounds = array<i64: 512, 8>}, {pipeline_mode = #tpu.pipeline_mode<synchronous>, transform_indices = @transform_8, window_bounds = array<i64: 1, 8>}, {transform_indices = @transform_9, window_bounds = array<i64: 2, 8>}]} {
    %c0 = arith.constant 0 : index
    %c0_0 = arith.constant 0 : index
    %0 = vector.load %arg1[%c0, %c0_0] : memref<2x16xf32, #tpu.memory_space<vmem>>, vector<2x16xf32>
    %1 = arith.truncf %0 : vector<2x16xf32> to vector<2x16xbf16>
    %c0_1 = arith.constant 0 : index
    %c0_2 = arith.constant 0 : index
    %2 = vector.load %arg2[%c0_1, %c0_2] : memref<16x512xbf16, #tpu.memory_space<vmem>>, vector<16x512xbf16>
    %cst = arith.constant dense<0.000000e+00> : vector<2x512xf32>
    %3 = tpu.matmul %1, %2, %cst {dimension_numbers = #tpu.dot_dimension_numbers<[1], [0], [0], [1], [0, 0, 1, 1], [], []>} : vector<2x16xbf16>, vector<16x512xbf16>, vector<2x512xf32> -> vector<2x512xf32>
    %c0_3 = arith.constant 0 : index
    %c0_4 = arith.constant 0 : index
    %4 = vector.load %arg3[%c0_3, %c0_4] : memref<1x512xf32, #tpu.memory_space<vmem>>, vector<1x512xf32>
    %5 = vector.broadcast %4 : vector<1x512xf32> to vector<2x512xf32>
    %6 = arith.addf %3, %5 : vector<2x512xf32>
    %cst_5 = arith.constant 0.000000e+00 : f32
    %7 = vector.broadcast %cst_5 : f32 to vector<2x512xf32>
    %8 = arith.maximumf %6, %7 : vector<2x512xf32>
    %9 = arith.truncf %8 : vector<2x512xf32> to vector<2x512xbf16>
    %c0_6 = arith.constant 0 : index
    %c0_7 = arith.constant 0 : index
    %10 = vector.load %arg4[%c0_6, %c0_7] : memref<512x512xbf16, #tpu.memory_space<vmem>>, vector<512x512xbf16>
    %cst_8 = arith.constant dense<0.000000e+00> : vector<2x512xf32>
    %11 = tpu.matmul %9, %10, %cst_8 {dimension_numbers = #tpu.dot_dimension_numbers<[1], [0], [0], [1], [0, 0, 1, 1], [], []>} : vector<2x512xbf16>, vector<512x512xbf16>, vector<2x512xf32> -> vector<2x512xf32>
    %c0_9 = arith.constant 0 : index
    %c0_10 = arith.constant 0 : index
    %12 = vector.load %arg5[%c0_9, %c0_10] : memref<1x512xf32, #tpu.memory_space<vmem>>, vector<1x512xf32>
    %13 = vector.broadcast %12 : vector<1x512xf32> to vector<2x512xf32>
    %14 = arith.addf %11, %13 : vector<2x512xf32>
    %cst_11 = arith.constant 0.000000e+00 : f32
    %15 = vector.broadcast %cst_11 : f32 to vector<2x512xf32>
    %16 = arith.maximumf %14, %15 : vector<2x512xf32>
    %17 = arith.truncf %16 : vector<2x512xf32> to vector<2x512xbf16>
    %c0_12 = arith.constant 0 : index
    %c0_13 = arith.constant 0 : index
    %18 = vector.load %arg6[%c0_12, %c0_13] : memref<512x512xbf16, #tpu.memory_space<vmem>>, vector<512x512xbf16>
    %cst_14 = arith.constant dense<0.000000e+00> : vector<2x512xf32>
    %19 = tpu.matmul %17, %18, %cst_14 {dimension_numbers = #tpu.dot_dimension_numbers<[1], [0], [0], [1], [0, 0, 1, 1], [], []>} : vector<2x512xbf16>, vector<512x512xbf16>, vector<2x512xf32> -> vector<2x512xf32>
    %c0_15 = arith.constant 0 : index
    %c0_16 = arith.constant 0 : index
    %20 = vector.load %arg7[%c0_15, %c0_16] : memref<1x512xf32, #tpu.memory_space<vmem>>, vector<1x512xf32>
    %21 = vector.broadcast %20 : vector<1x512xf32> to vector<2x512xf32>
    %22 = arith.addf %19, %21 : vector<2x512xf32>
    %cst_17 = arith.constant 0.000000e+00 : f32
    %23 = vector.broadcast %cst_17 : f32 to vector<2x512xf32>
    %24 = arith.maximumf %22, %23 : vector<2x512xf32>
    %25 = arith.truncf %24 : vector<2x512xf32> to vector<2x512xbf16>
    %c0_18 = arith.constant 0 : index
    %c0_19 = arith.constant 0 : index
    %26 = vector.load %arg8[%c0_18, %c0_19] : memref<512x8xbf16, #tpu.memory_space<vmem>>, vector<512x8xbf16>
    %cst_20 = arith.constant dense<0.000000e+00> : vector<2x8xf32>
    %27 = tpu.matmul %25, %26, %cst_20 {dimension_numbers = #tpu.dot_dimension_numbers<[1], [0], [0], [1], [0, 0, 1, 1], [], []>} : vector<2x512xbf16>, vector<512x8xbf16>, vector<2x8xf32> -> vector<2x8xf32>
    %c0_21 = arith.constant 0 : index
    %c0_22 = arith.constant 0 : index
    %28 = vector.load %arg9[%c0_21, %c0_22] : memref<1x8xf32, #tpu.memory_space<vmem>>, vector<1x8xf32>
    %29 = vector.broadcast %28 : vector<1x8xf32> to vector<2x8xf32>
    %30 = arith.addf %27, %29 : vector<2x8xf32>
    %c0_23 = arith.constant 0 : index
    %c0_24 = arith.constant 0 : index
    %31 = vector.load %arg10[%c0_23, %c0_24] : memref<2x8xf32, #tpu.memory_space<vmem>>, vector<2x8xf32>
    tpu.vector_store %arg10[%c0_23, %c0_24], %30 {strides = array<i32>} : memref<2x8xf32, #tpu.memory_space<vmem>>, vector<2x8xf32>,
    return
  }
  func.func @transform_0(%arg0: i32) -> (i32, i32) {
    %c0_i32 = arith.constant 0 : i32
    %c0_i32_0 = arith.constant 0 : i32
    return %arg0, %c0_i32 : i32, i32
  }
  func.func @transform_1(%arg0: i32) -> (i32, i32) {
    %c0_i32 = arith.constant 0 : i32
    %c0_i32_0 = arith.constant 0 : i32
    %c0_i32_1 = arith.constant 0 : i32
    return %c0_i32, %c0_i32_0 : i32, i32
  }
  func.func @transform_2(%arg0: i32) -> (i32, i32) {
    %c0_i32 = arith.constant 0 : i32
    %c0_i32_0 = arith.constant 0 : i32
    %c0_i32_1 = arith.constant 0 : i32
    return %c0_i32, %c0_i32_0 : i32, i32
  }
  func.func @transform_3(%arg0: i32) -> (i32, i32) {
    %c0_i32 = arith.constant 0 : i32
    %c0_i32_0 = arith.constant 0 : i32
    %c0_i32_1 = arith.constant 0 : i32
    return %c0_i32, %c0_i32_0 : i32, i32
  }
  func.func @transform_4(%arg0: i32) -> (i32, i32) {
    %c0_i32 = arith.constant 0 : i32
    %c0_i32_0 = arith.constant 0 : i32
    %c0_i32_1 = arith.constant 0 : i32
    return %c0_i32, %c0_i32_0 : i32, i32
  }
  func.func @transform_5(%arg0: i32) -> (i32, i32) {
    %c0_i32 = arith.constant 0 : i32
    %c0_i32_0 = arith.constant 0 : i32
    %c0_i32_1 = arith.constant 0 : i32
    return %c0_i32, %c0_i32_0 : i32, i32
  }
  func.func @transform_6(%arg0: i32) -> (i32, i32) {
    %c0_i32 = arith.constant 0 : i32
    %c0_i32_0 = arith.constant 0 : i32
    %c0_i32_1 = arith.constant 0 : i32
    return %c0_i32, %c0_i32_0 : i32, i32
  }
  func.func @transform_7(%arg0: i32) -> (i32, i32) {
    %c0_i32 = arith.constant 0 : i32
    %c0_i32_0 = arith.constant 0 : i32
    %c0_i32_1 = arith.constant 0 : i32
    return %c0_i32, %c0_i32_0 : i32, i32
  }
  func.func @transform_8(%arg0: i32) -> (i32, i32) {
    %c0_i32 = arith.constant 0 : i32
    %c0_i32_0 = arith.constant 0 : i32
    %c0_i32_1 = arith.constant 0 : i32
    return %c0_i32, %c0_i32_0 : i32, i32
  }
  func.func @transform_9(%arg0: i32) -> (i32, i32) {
    %c0_i32 = arith.constant 0 : i32
    %c0_i32_0 = arith.constant 0 : i32
    return %arg0, %c0_i32 : i32, i32
  }
}

</mosaic_0001>

<bundles_post_ra>
// kernel: tpu_custom_call.1
= control target key start
LH: loop header
LB: loop body
LE: loop exit
PB: predicated region body
PF: predicated region fallthrough
CT: control target
= control target key end

     0   :  { %14 = vsyncpa [#allocation3], 0  ;;  %s3611_s0 = inlined_call_operand.vmem [shape: f32[2,16], index: 0, kind: input, shape index: {}]   ;;  %s3612_s1 = inlined_call_operand.vmem [shape: bf16[16,512], index: 1, kind: input, shape index: {}]   ;;  %s3613_s2 = inlined_call_operand.vmem [shape: f32[1,512], index: 2, kind: input, shape index: {}]   ;;  %s3614_s3 = inlined_call_operand.hbm [shape: bf16[512,512], index: 3, kind: input, shape index: {}]   ;;  %s3615_s4 = inlined_call_operand.vmem [shape: f32[1,512], index: 4, kind: input, shape index: {}]   ;;  %s3616_s5 = inlined_call_operand.hbm [shape: bf16[512,512], index: 5, kind: input, shape index: {}]   ;;  %s3617_s6 = inlined_call_operand.vmem [shape: f32[1,512], index: 6, kind: input, shape index: {}]   ;;  %s3618_s7 = inlined_call_operand.vmem [shape: bf16[512,8], index: 7, kind: input, shape index: {}]   ;;  %s3619_s8 = inlined_call_operand.vmem [shape: f32[1,8], index: 8, kind: input, shape index: {}]   ;;  %s3620_s9 = inlined_call_operand.hbm [shape: f32[2,8], index: 9, kind: output, shape index: {}]  }
   0x1   :  { %15 = vsyncpa [#allocation6], 0 }
   0x2   :  { %16 = vsyncpa [#allocation4], 0  ;;  %s3352_s30 = smov [#allocation2]   ;;  %s3280_s13 = scalar_lea.hbm %s3614_s3, 16384 }
   0x3   :  { %s28_s10 = sshll.u32 %s3352_s30, 4  ;;  %p3281_p0 = scmp.ne.s32.totalorder %s3614_s3, %s3280_s13  ;;  %s29_s10 = int_to_ptr.vmem [resolvable:$true] %s28_s10 }
   0x4   :  { %p3284_p1 = scmp.lt.u32.totalorder %s3280_s13, %s3614_s3 }
   0x6   :  { %p3286_p2 = pnand %p3284_p1, %p3281_p0 }
   0x8   :  { %3289 = shalt.err (!%p3286_p2)
}
   0x9   :  { %s3290_s18 = scalar_lea.vmem %s29_s10, 16384  ;;  %p3295_p4 = scmp.lt.s32.totalorder %s29_s10, %s29_s10 }
   0xa   :  { %p3291_p3 = scmp.ne.s32.totalorder %s29_s10, %s3290_s18  ;;  %p3296_p5 = scmp.lt.s32.totalorder %s3290_s18, %s3290_s18 }
   0xc   :  { %p3297_p6 = por %p3296_p5, %p3295_p4 }
   0xe   :  { %p3298_p7 = pnand %p3297_p6, %p3291_p3 }
  0x10   :  { %3301 = shalt.err (!%p3298_p7)
}
  0x11   :  { %s3353_s19 = smov 256   ;;  %s3354_s20 = smov 16  }
  0x12   :  { %34 = dma.hbm_to_vmem [thread:$0]  %s3614_s3, 16384, %s29_s10, [#allocation3], %s3353_s19, %s3353_s19, %s3354_s20  }
  0x13   :  { %s3355_s23 = smov [#allocation5]   ;;  %s3302_s27 = scalar_lea.hbm %s3616_s5, 16384 }
  0x14   :  { %s42_s24 = sshll.u32 %s3355_s23, 4  ;;  %p3303_p8 = scmp.ne.s32.totalorder %s3616_s5, %s3302_s27  ;;  %s43_s24 = int_to_ptr.vmem [resolvable:$true] %s42_s24 }
  0x15   :  { %p3306_p9 = scmp.lt.u32.totalorder %s3302_s27, %s3616_s5 }
  0x17   :  { %p3308_p10 = pnand %p3306_p9, %p3303_p8 }
  0x19   :  { %3311 = shalt.err (!%p3308_p10)
}
  0x1a   :  { %s3312_s12 = scalar_lea.vmem %s43_s24, 16384  ;;  %p3317_p12 = scmp.lt.s32.totalorder %s43_s24, %s43_s24 }
  0x1b   :  { %p3313_p11 = scmp.ne.s32.totalorder %s43_s24, %s3312_s12  ;;  %p3318_p13 = scmp.lt.s32.totalorder %s3312_s12, %s3312_s12 }
  0x1d   :  { %p3319_p0 = por %p3318_p13, %p3317_p12 }
  0x1f   :  { %p3320_p1 = pnand %p3319_p0, %p3313_p11 }
  0x21   :  { %3323 = shalt.err (!%p3320_p1)
}
  0x22   :  { %48 = dma.hbm_to_vmem [thread:$0]  %s3616_s5, 16384, %s43_s24, [#allocation6], %s3353_s19, %s3353_s19, %s3354_s20  }
  0x23   :  { %3346 = dma.done.wait [#allocation3], 16384  }
  0x24   :  { %3347 = vsyncadd [#allocation3], 4294950912 }
  0x25   :  { %3348 = dma.done.wait [#allocation6], 16384  }
  0x26   :  { %3349 = vsyncadd [#allocation6], 4294950912  ;;  %v3356_v0 = vmov 0   ;;  %v2858_v1 = vld [vmem:[%s3612_s1 + $0x4] ss:$16 sps:$4 sm:$0xff]   ;;  %vm110_vm0 = vcmask 130048  }
  0x27   :  { %146 = vmatprep.mubr.bf16.mxu0 %v3356_v0  ;;  %187 = vmatprep.mubr.bf16.mxu1 %v3356_v0  ;;  %v2860_v2 = vld [vmem:[%s3612_s1] ss:$16 sps:$4 sm:$0xff]   ;;  %v2861_v5 = vld [vmem:[%s3612_s1 + $0xc] ss:$16 sps:$4 sm:$0xff]   ;;  %v2863_v6 = vld [vmem:[%s3612_s1 + $0x8] ss:$16 sps:$4 sm:$0xff]  }
  0x28   :  { %v62_v3 = vld [vmem:[%s3611_s0] sm:$0x3]  ;;  %114 = vmatprep.subr.bf16.mxu0 %v2858_v1  ;;  %155 = vmatprep.subr.bf16.mxu1 %v2861_v5  ;;  %v2866_v8 = vld [vmem:[#allocation2 + $0x4] ss:$16 sps:$4 sm:$0xff]   ;;  %v2867_v9 = vld [vmem:[#allocation2 + $0x8] ss:$16 sps:$4 sm:$0xff]  }
  0x29   :  { %v63_v4 = vpack.c.bf16 %v62_v3, %v62_v3  ;;  %115 = vmatpush1.bf16.msra.mxu0 %v2860_v2  ;;  %v2864_v7 = vld [vmem:[#allocation2] ss:$16 sps:$4 sm:$0xff]   ;;  %156 = vmatpush1.bf16.msra.mxu1 %v2863_v6  ;;  %v2869_v10 = vld [vmem:[#allocation2 + $0xc] ss:$16 sps:$4 sm:$0xff]   ;;  %v2872_v11 = vld [vmem:[#allocation2 + $0x24] ss:$16 sps:$4 sm:$0xff]  }
  0x2a   :  { %994 = vmatprep.subr.bf16.mxu0 %v2866_v8  ;;  %1076 = vmatprep.subr.bf16.mxu1 %v2869_v10  ;;  %v2870_v12 = vld [vmem:[#allocation2 + $0x20] ss:$16 sps:$4 sm:$0xff]   ;;  %v2875_v13 = vld [vmem:[#allocation2 + $0x2c] ss:$16 sps:$4 sm:$0xff]   ;;  %v2873_v14 = vld [vmem:[#allocation2 + $0x28] ss:$16 sps:$4 sm:$0xff]  }
  0x2b   :  { %v2878_v15 = vld [vmem:[#allocation2 + $0x44] ss:$16 sps:$4 sm:$0xff]   ;;  %v2881_v16 = vld [vmem:[#allocation2 + $0x4c] ss:$16 sps:$4 sm:$0xff]   ;;  %v2876_v17 = vld [vmem:[#allocation2 + $0x40] ss:$16 sps:$4 sm:$0xff]  }
  0x2c   :  { %2493 = vmatmul.mubr.msk.bf16.vlgmr.msra.gmra.mrb[0].mxu0 %vm110_vm0, %v63_v4  ;;  %2494 = vmatmul.mubr.msk.bf16.vlgmr.msra.gmra.mrb[0].mxu1 %vm110_vm0, %v63_v4  ;;  %v2884_v18 = vld [vmem:[#allocation2 + $0x64] ss:$16 sps:$4 sm:$0xff]   ;;  %v2879_v19 = vld [vmem:[#allocation2 + $0x48] ss:$16 sps:$4 sm:$0xff]   ;;  %v2887_v20 = vld [vmem:[#allocation2 + $0x6c] ss:$16 sps:$4 sm:$0xff]  }
  0x2d   :  { %995 = vmatpush1.bf16.msra.mxu0 %v2864_v7  ;;  %1077 = vmatpush1.bf16.msra.mxu1 %v2867_v9  ;;  %v2882_v21 = vld [vmem:[#allocation2 + $0x60] ss:$16 sps:$4 sm:$0xff]   ;;  %v2890_v22 = vld [vmem:[#allocation2 + $0x84] ss:$16 sps:$4 sm:$0xff]   ;;  %v2885_v23 = vld [vmem:[#allocation2 + $0x68] ss:$16 sps:$4 sm:$0xff]   ;;  %v70_v9 = vlaneseq }
  0x2e   :  { %996 = vmatprep.subr.bf16.mxu0 %v2872_v11  ;;  %1078 = vmatprep.subr.bf16.mxu1 %v2875_v13  ;;  %v2893_v24 = vld [vmem:[#allocation2 + $0x8c] ss:$16 sps:$4 sm:$0xff]   ;;  %v2888_v25 = vld [vmem:[#allocation2 + $0x80] ss:$16 sps:$4 sm:$0xff]   ;;  %v2896_v26 = vld [vmem:[#allocation2 + $0xa4] ss:$16 sps:$4 sm:$0xff]  }
  0x2f   :  { %v2891_v27 = vld [vmem:[#allocation2 + $0x88] ss:$16 sps:$4 sm:$0xff]   ;;  %v2899_v28 = vld [vmem:[#allocation2 + $0xac] ss:$16 sps:$4 sm:$0xff]   ;;  %v2894_v29 = vld [vmem:[#allocation2 + $0xa0] ss:$16 sps:$4 sm:$0xff]  }
  0x30   :  { %v2902_v30 = vld [vmem:[#allocation2 + $0xc4] ss:$16 sps:$4 sm:$0xff]   ;;  %v2897_v31 = vld [vmem:[#allocation2 + $0xa8] ss:$16 sps:$4 sm:$0xff]   ;;  %v2905_v32 = vld [vmem:[#allocation2 + $0xcc] ss:$16 sps:$4 sm:$0xff]  }
  0x31   :  { %997 = vmatpush1.bf16.msra.mxu0 %v2870_v12  ;;  %1079 = vmatpush1.bf16.msra.mxu1 %v2873_v14  ;;  %v2900_v33 = vld [vmem:[#allocation2 + $0xc0] ss:$16 sps:$4 sm:$0xff]   ;;  %v2908_v34 = vld [vmem:[#allocation2 + $0xe4] ss:$16 sps:$4 sm:$0xff]   ;;  %v2903_v35 = vld [vmem:[#allocation2 + $0xc8] ss:$16 sps:$4 sm:$0xff]  }
  0x32   :  { %998 = vmatprep.subr.bf16.mxu0 %v2878_v15  ;;  %1080 = vmatprep.subr.bf16.mxu1 %v2881_v16  ;;  %v2911_v36 = vld [vmem:[#allocation2 + $0xec] ss:$16 sps:$4 sm:$0xff]   ;;  %v2906_v37 = vld [vmem:[#allocation2 + $0xe0] ss:$16 sps:$4 sm:$0xff]   ;;  %v2914_v38 = vld [vmem:[#allocation2 + $0x104] ss:$16 sps:$4 sm:$0xff]  }
  0x33   :  { %v2909_v39 = vld [vmem:[#allocation2 + $0xe8] ss:$16 sps:$4 sm:$0xff]   ;;  %v2917_v40 = vld [vmem:[#allocation2 + $0x10c] ss:$16 sps:$4 sm:$0xff]   ;;  %v2912_v41 = vld [vmem:[#allocation2 + $0x100] ss:$16 sps:$4 sm:$0xff]  }
  0x34   :  { %v2920_v42 = vld [vmem:[#allocation2 + $0x124] ss:$16 sps:$4 sm:$0xff]   ;;  %v2915_v43 = vld [vmem:[#allocation2 + $0x108] ss:$16 sps:$4 sm:$0xff]   ;;  %v2918_v44 = vld [vmem:[#allocation2 + $0x120] ss:$16 sps:$4 sm:$0xff]  }
  0x35   :  { %999 = vmatpush1.bf16.msra.mxu0 %v2876_v17  ;;  %1081 = vmatpush1.bf16.msra.mxu1 %v2879_v19  ;;  %v2923_v45 = vld [vmem:[#allocation2 + $0x12c] ss:$16 sps:$4 sm:$0xff]   ;;  %v2921_v46 = vld [vmem:[#allocation2 + $0x128] ss:$16 sps:$4 sm:$0xff]   ;;  %v2926_v47 = vld [vmem:[#allocation2 + $0x144] ss:$16 sps:$4 sm:$0xff]  }
  0x36   :  { %1000 = vmatprep.subr.bf16.mxu0 %v2884_v18  ;;  %1082 = vmatprep.subr.bf16.mxu1 %v2887_v20  ;;  %v2929_v48 = vld [vmem:[#allocation2 + $0x14c] ss:$16 sps:$4 sm:$0xff]   ;;  %v2924_v49 = vld [vmem:[#allocation2 + $0x140] ss:$16 sps:$4 sm:$0xff]   ;;  %v2932_v50 = vld [vmem:[#allocation2 + $0x164] ss:$16 sps:$4 sm:$0xff]  }
  0x37   :  { %v2927_v51 = vld [vmem:[#allocation2 + $0x148] ss:$16 sps:$4 sm:$0xff]   ;;  %v2935_v52 = vld [vmem:[#allocation2 + $0x16c] ss:$16 sps:$4 sm:$0xff]   ;;  %v2930_v53 = vld [vmem:[#allocation2 + $0x160] ss:$16 sps:$4 sm:$0xff]  }
  0x38   :  { %v2938_v54 = vld [vmem:[#allocation2 + $0x184] ss:$16 sps:$4 sm:$0xff]   ;;  %v2933_v55 = vld [vmem:[#allocation2 + $0x168] ss:$16 sps:$4 sm:$0xff]   ;;  %v2941_v56 = vld [vmem:[#allocation2 + $0x18c] ss:$16 sps:$4 sm:$0xff]  }
  0x39   :  { %1001 = vmatpush1.bf16.msra.mxu0 %v2882_v21  ;;  %1083 = vmatpush1.bf16.msra.mxu1 %v2885_v23  ;;  %v2936_v57 = vld [vmem:[#allocation2 + $0x180] ss:$16 sps:$4 sm:$0xff]   ;;  %v2944_v58 = vld [vmem:[#allocation2 + $0x1a4] ss:$16 sps:$4 sm:$0xff]   ;;  %v2939_v59 = vld [vmem:[#allocation2 + $0x188] ss:$16 sps:$4 sm:$0xff]  }
  0x3a   :  { %1002 = vmatprep.subr.bf16.mxu0 %v2890_v22  ;;  %1084 = vmatprep.subr.bf16.mxu1 %v2893_v24  ;;  %v2947_v60 = vld [vmem:[#allocation2 + $0x1ac] ss:$16 sps:$4 sm:$0xff]   ;;  %v2942_v61 = vld [vmem:[#allocation2 + $0x1a0] ss:$16 sps:$4 sm:$0xff]   ;;  %v2945_v62 = vld [vmem:[#allocation2 + $0x1a8] ss:$16 sps:$4 sm:$0xff]  }
  0x3b   :  { %v2950_v63 = vld [vmem:[#allocation2 + $0x1c4] ss:$16 sps:$4 sm:$0xff]   ;;  %v2953_v0 = vld [vmem:[#allocation2 + $0x1cc] ss:$16 sps:$4 sm:$0xff]   ;;  %v2948_v1 = vld [vmem:[#allocation2 + $0x1c0] ss:$16 sps:$4 sm:$0xff]  }
  0x3c   :  { %v2951_v2 = vld [vmem:[#allocation2 + $0x1c8] ss:$16 sps:$4 sm:$0xff]   ;;  %v2956_v3 = vld [vmem:[#allocation2 + $0x1e4] ss:$16 sps:$4 sm:$0xff]   ;;  %v2959_v4 = vld [vmem:[#allocation2 + $0x1ec] ss:$16 sps:$4 sm:$0xff]  }
  0x3d   :  { %1003 = vmatpush1.bf16.msra.mxu0 %v2888_v25  ;;  %1085 = vmatpush1.bf16.msra.mxu1 %v2891_v27  ;;  %v2954_v5 = vld [vmem:[#allocation2 + $0x1e0] ss:$16 sps:$4 sm:$0xff]   ;;  %v2957_v6 = vld [vmem:[#allocation2 + $0x1e8] ss:$16 sps:$4 sm:$0xff]   ;;  %v2962_v7 = vld [vmem:[#allocation2 + $0x204] ss:$16 sps:$4 sm:$0xff]  }
  0x3e   :  { %1004 = vmatprep.subr.bf16.mxu0 %v2896_v26  ;;  %1086 = vmatprep.subr.bf16.mxu1 %v2899_v28  ;;  %v2965_v8 = vld [vmem:[#allocation2 + $0x20c] ss:$16 sps:$4 sm:$0xff]   ;;  %v3447_v10 = vshrl.u32 %v70_v9, 7  ;;  %v3455_v12 = vld [vmem:[%s3613_s2] sm:$0xf]  ;;  %s3357_s10 = smov [#allocation7]  }
  0x3f   :  { %v3022_v9 = vld [vmem:[#allocation2 + $0x344] ss:$16 sps:$4 sm:$0xff]   ;;  %s2479_s13 = sshll.u32 %s3357_s10, 4  ;;  %vm2471_vm1 = vcmask 58368   ;;  %s2480_s13 = int_to_ptr.vmem [resolvable:$true] %s2479_s13 }
  0x40   :  { %v3450_v11 = vsub.s32 0, %v3447_v10  ;;  %v3458_v13 = vsub.s32 1, %v3447_v10  ;;  %v3461_v14 = vsub.s32 3, %v3447_v10  ;;  %s3324_s14 = scalar_lea.vmem %s2480_s13, 32  ;;  %p3329_p3 = scmp.lt.s32.totalorder %s2480_s13, %s2480_s13 }
  0x41   :  { %1005 = vmatpush1.bf16.msra.mxu0 %v2894_v29  ;;  %1087 = vmatpush1.bf16.msra.mxu1 %v2897_v31  ;;  %p3325_p2 = scmp.ne.s32.totalorder %s2480_s13, %s3324_s14  ;;  %p3330_p4 = scmp.lt.s32.totalorder %s3324_s14, %s3324_s14 }
  0x42   :  { %1006 = vmatprep.subr.bf16.mxu0 %v2902_v30  ;;  %1088 = vmatprep.subr.bf16.mxu1 %v2905_v32  ;;  %v73_v15 = vrot.slane %v3455_v12, %v3450_v11  ;;  %v77_v16 = vrot.slane %v3455_v12, %v3458_v13  ;;  %v85_v18 = vrot.slane %v3455_v12, %v3461_v14  ;;  %v2960_v32 = vld [vmem:[#allocation2 + $0x200] ss:$16 sps:$4 sm:$0xff]  }
  0x43   :  { %p3331_p5 = por %p3330_p4, %p3329_p3 }
  0x45   :  { %1007 = vmatpush1.bf16.msra.mxu0 %v2900_v33  ;;  %1089 = vmatpush1.bf16.msra.mxu1 %v2903_v35  ;;  %v2963_v33 = vld [vmem:[#allocation2 + $0x208] ss:$16 sps:$4 sm:$0xff]   ;;  %p3332_p6 = pnand %p3331_p5, %p3325_p2 }
  0x46   :  { %1008 = vmatprep.subr.bf16.mxu0 %v2908_v34  ;;  %1090 = vmatprep.subr.bf16.mxu1 %v2911_v36  ;;  %v2968_v36 = vld [vmem:[#allocation2 + $0x224] ss:$16 sps:$4 sm:$0xff]  }
  0x49   :  { %1009 = vmatpush1.bf16.msra.mxu0 %v2906_v37  ;;  %1091 = vmatpush1.bf16.msra.mxu1 %v2909_v39  ;;  %v2971_v37 = vld [vmem:[#allocation2 + $0x22c] ss:$16 sps:$4 sm:$0xff]   ;;  %v2966_v39 = vld [vmem:[#allocation2 + $0x220] ss:$16 sps:$4 sm:$0xff]  }
  0x4a   :  { %1010 = vmatprep.subr.bf16.mxu0 %v2914_v38  ;;  %1092 = vmatprep.subr.bf16.mxu1 %v2917_v40  ;;  %v2969_v40 = vld [vmem:[#allocation2 + $0x228] ss:$16 sps:$4 sm:$0xff]  }
  0x4d   :  { %1011 = vmatpush1.bf16.msra.mxu0 %v2912_v41  ;;  %1093 = vmatpush1.bf16.msra.mxu1 %v2915_v43  ;;  %v2974_v41 = vld [vmem:[#allocation2 + $0x244] ss:$16 sps:$4 sm:$0xff]   ;;  %v2972_v43 = vld [vmem:[#allocation2 + $0x240] ss:$16 sps:$4 sm:$0xff]  }
  0x4e   :  { %1012 = vmatprep.subr.bf16.mxu0 %v2920_v42  ;;  %1094 = vmatprep.subr.bf16.mxu1 %v2923_v45  ;;  %v2977_v42 = vld [vmem:[#allocation2 + $0x24c] ss:$16 sps:$4 sm:$0xff]   ;;  %v2980_v45 = vld [vmem:[#allocation2 + $0x264] ss:$16 sps:$4 sm:$0xff]  }
  0x51   :  { %1013 = vmatpush1.bf16.msra.mxu0 %v2918_v44  ;;  %1095 = vmatpush1.bf16.msra.mxu1 %v2921_v46  ;;  %v2975_v44 = vld [vmem:[#allocation2 + $0x248] ss:$16 sps:$4 sm:$0xff]   ;;  %v2983_v46 = vld [vmem:[#allocation2 + $0x26c] ss:$16 sps:$4 sm:$0xff]  }
  0x52   :  { %1014 = vmatprep.subr.bf16.mxu0 %v2926_v47  ;;  %1096 = vmatprep.subr.bf16.mxu1 %v2929_v48  ;;  %v2978_v47 = vld [vmem:[#allocation2 + $0x260] ss:$16 sps:$4 sm:$0xff]   ;;  %v2981_v48 = vld [vmem:[#allocation2 + $0x268] ss:$16 sps:$4 sm:$0xff]  }
  0x55   :  { %1015 = vmatpush1.bf16.msra.mxu0 %v2924_v49  ;;  %1097 = vmatpush1.bf16.msra.mxu1 %v2927_v51  ;;  %v2986_v49 = vld [vmem:[#allocation2 + $0x284] ss:$16 sps:$4 sm:$0xff]   ;;  %v2984_v51 = vld [vmem:[#allocation2 + $0x280] ss:$16 sps:$4 sm:$0xff]  }
  0x56   :  { %1016 = vmatprep.subr.bf16.mxu0 %v2932_v50  ;;  %1098 = vmatprep.subr.bf16.mxu1 %v2935_v52  ;;  %v2989_v50 = vld [vmem:[#allocation2 + $0x28c] ss:$16 sps:$4 sm:$0xff]   ;;  %v2987_v52 = vld [vmem:[#allocation2 + $0x288] ss:$16 sps:$4 sm:$0xff]  }
  0x59   :  { %1017 = vmatpush1.bf16.msra.mxu0 %v2930_v53  ;;  %1099 = vmatpush1.bf16.msra.mxu1 %v2933_v55  ;;  %v2992_v53 = vld [vmem:[#allocation2 + $0x2a4] ss:$16 sps:$4 sm:$0xff]   ;;  %v2990_v55 = vld [vmem:[#allocation2 + $0x2a0] ss:$16 sps:$4 sm:$0xff]  }
  0x5a   :  { %1018 = vmatprep.subr.bf16.mxu0 %v2938_v54  ;;  %1100 = vmatprep.subr.bf16.mxu1 %v2941_v56  ;;  %v2995_v54 = vld [vmem:[#allocation2 + $0x2ac] ss:$16 sps:$4 sm:$0xff]   ;;  %v2993_v56 = vld [vmem:[#allocation2 + $0x2a8] ss:$16 sps:$4 sm:$0xff]  }
  0x5d   :  { %1019 = vmatpush1.bf16.msra.mxu0 %v2936_v57  ;;  %1101 = vmatpush1.bf16.msra.mxu1 %v2939_v59  ;;  %v2998_v57 = vld [vmem:[#allocation2 + $0x2c4] ss:$16 sps:$4 sm:$0xff]   ;;  %v2996_v59 = vld [vmem:[#allocation2 + $0x2c0] ss:$16 sps:$4 sm:$0xff]  }
  0x5e   :  { %1020 = vmatprep.subr.bf16.mxu0 %v2944_v58  ;;  %1102 = vmatprep.subr.bf16.mxu1 %v2947_v60  ;;  %v3001_v58 = vld [vmem:[#allocation2 + $0x2cc] ss:$16 sps:$4 sm:$0xff]   ;;  %v2999_v60 = vld [vmem:[#allocation2 + $0x2c8] ss:$16 sps:$4 sm:$0xff]  }
  0x61   :  { %1021 = vmatpush1.bf16.msra.mxu0 %v2942_v61  ;;  %1103 = vmatpush1.bf16.msra.mxu1 %v2945_v62  ;;  %v3004_v61 = vld [vmem:[#allocation2 + $0x2e4] ss:$16 sps:$4 sm:$0xff]   ;;  %v3007_v62 = vld [vmem:[#allocation2 + $0x2ec] ss:$16 sps:$4 sm:$0xff]  }
  0x62   :  { %1022 = vmatprep.subr.bf16.mxu0 %v2950_v63  ;;  %1104 = vmatprep.subr.bf16.mxu1 %v2953_v0  ;;  %v3002_v63 = vld [vmem:[#allocation2 + $0x2e0] ss:$16 sps:$4 sm:$0xff]   ;;  %v3005_v0 = vld [vmem:[#allocation2 + $0x2e8] ss:$16 sps:$4 sm:$0xff]  }
  0x65   :  { %1023 = vmatpush1.bf16.msra.mxu0 %v2948_v1  ;;  %1105 = vmatpush1.bf16.msra.mxu1 %v2951_v2  ;;  %v3010_v1 = vld [vmem:[#allocation2 + $0x304] ss:$16 sps:$4 sm:$0xff]   ;;  %v3013_v2 = vld [vmem:[#allocation2 + $0x30c] ss:$16 sps:$4 sm:$0xff]  }
  0x66   :  { %1024 = vmatprep.subr.bf16.mxu0 %v2956_v3  ;;  %1106 = vmatprep.subr.bf16.mxu1 %v2959_v4  ;;  %v3008_v3 = vld [vmem:[#allocation2 + $0x300] ss:$16 sps:$4 sm:$0xff]   ;;  %v3011_v4 = vld [vmem:[#allocation2 + $0x308] ss:$16 sps:$4 sm:$0xff]  }
  0x69   :  { %1025 = vmatpush1.bf16.msra.mxu0 %v2954_v5  ;;  %1107 = vmatpush1.bf16.msra.mxu1 %v2957_v6  ;;  %v3016_v5 = vld [vmem:[#allocation2 + $0x324] ss:$16 sps:$4 sm:$0xff]   ;;  %v3019_v6 = vld [vmem:[#allocation2 + $0x32c] ss:$16 sps:$4 sm:$0xff]  }
  0x6a   :  { %1035 = vmatprep.subr.bf16.mxu0 %v2962_v7  ;;  %1117 = vmatprep.subr.bf16.mxu1 %v2965_v8  ;;  %v3014_v7 = vld [vmem:[#allocation2 + $0x320] ss:$16 sps:$4 sm:$0xff]   ;;  %v3017_v8 = vld [vmem:[#allocation2 + $0x328] ss:$16 sps:$4 sm:$0xff]  }
  0xff   :  { %v148_v17 = vpop.f32.mrb[0].mxu0  ;;  %v3469_v23 = vpop.f32.mrb[0].mxu1 }
 0x100   :  { %v149_v19 = vadd.f32 %v148_v17, %v73_v15  ;;  %v150_v20 = vpop.f32.mrb[1].mxu0  ;;  %v191_v26 = vpop.f32.mrb[1].mxu1  ;;  %v3025_v15 = vld [vmem:[#allocation2 + $0x34c] ss:$16 sps:$4 sm:$0xff]   ;;  %v3023_v17 = vld [vmem:[#allocation2 + $0x348] ss:$16 sps:$4 sm:$0xff]  }
 0x101   :  { %v151_v21 = vadd.f32 %v150_v20, %v77_v16  ;;  %v152_v22 = vpop.f32.mrb[2].mxu0  ;;  %v192_v28 = vadd.f32 %v191_v26, %v85_v18  ;;  %v193_v29 = vpop.f32.mrb[2].mxu1  ;;  %v3020_v16 = vld [vmem:[#allocation2 + $0x340] ss:$16 sps:$4 sm:$0xff]   ;;  %v3028_v18 = vld [vmem:[#allocation2 + $0x364] ss:$16 sps:$4 sm:$0xff]  }
 0x102   :  { %v196_v24 = vmax.f32 %v149_v19, 0.0  ;;  %v153_v25 = vpop.f32.mrb[3].mxu0  ;;  %v194_v30 = vpop.f32.mrb[3].mxu1  ;;  %v3031_v19 = vld [vmem:[#allocation2 + $0x36c] ss:$16 sps:$4 sm:$0xff]  }
 0x103   :  { %v197_v27 = vmax.f32 %v151_v21, 0.0  ;;  %v199_v34 = vmax.f32 %v192_v28, 0.0  ;;  %v3026_v20 = vld [vmem:[#allocation2 + $0x360] ss:$16 sps:$4 sm:$0xff]   ;;  %v3029_v21 = vld [vmem:[#allocation2 + $0x368] ss:$16 sps:$4 sm:$0xff]  }
 0x104   :  { %v200_v35 = vpack.c.bf16 %v196_v24, %v196_v24  ;;  %v3034_v22 = vld [vmem:[#allocation2 + $0x384] ss:$16 sps:$4 sm:$0xff]   ;;  %v3037_v24 = vld [vmem:[#allocation2 + $0x38c] ss:$16 sps:$4 sm:$0xff]   ;;  %v3032_v25 = vld [vmem:[#allocation2 + $0x380] ss:$16 sps:$4 sm:$0xff]  }
 0x105   :  { %v201_v31 = vpack.c.bf16 %v197_v27, %v197_v27  ;;  %v203_v38 = vpack.c.bf16 %v199_v34, %v199_v34  ;;  %v3035_v26 = vld [vmem:[#allocation2 + $0x388] ss:$16 sps:$4 sm:$0xff]   ;;  %v3472_v27 = vsub.s32 2, %v3447_v10  ;;  %v3040_v28 = vld [vmem:[#allocation2 + $0x3a4] ss:$16 sps:$4 sm:$0xff]  }
 0x106   :  { %v3043_v29 = vld [vmem:[#allocation2 + $0x3ac] ss:$16 sps:$4 sm:$0xff]   ;;  %v3038_v30 = vld [vmem:[#allocation2 + $0x3a0] ss:$16 sps:$4 sm:$0xff]  }
 0x107   :  { %1026 = vmatprep.mubr.bf16.mxu0 %v201_v31  ;;  %1108 = vmatprep.mubr.bf16.mxu1 %v201_v31  ;;  %v3041_v31 = vld [vmem:[#allocation2 + $0x3a8] ss:$16 sps:$4 sm:$0xff]   ;;  %v3049_v34 = vld [vmem:[#allocation2 + $0x3cc] ss:$16 sps:$4 sm:$0xff]  }
 0x108   :  { %1027 = vmatmul.mubr.bf16.vlgmr.msra.gmra.mrb[4].mxu0 %v200_v35  ;;  %1109 = vmatmul.mubr.bf16.vlgmr.msra.gmra.mrb[4].mxu1 %v200_v35  ;;  %v3044_v35 = vld [vmem:[#allocation2 + $0x3c0] ss:$16 sps:$4 sm:$0xff]  }
 0x109   :  { %1036 = vmatpush1.bf16.msra.mxu0 %v2960_v32  ;;  %1118 = vmatpush1.bf16.msra.mxu1 %v2963_v33  ;;  %v81_v32 = vrot.slane %v3455_v12, %v3472_v27  ;;  %v3046_v33 = vld [vmem:[#allocation2 + $0x3c4] ss:$16 sps:$4 sm:$0xff]  }
 0x10a   :  { %1037 = vmatprep.subr.bf16.mxu0 %v2968_v36  ;;  %1119 = vmatprep.subr.bf16.mxu1 %v2971_v37  ;;  %v3047_v36 = vld [vmem:[#allocation2 + $0x3c8] ss:$16 sps:$4 sm:$0xff]   ;;  %v3052_v37 = vld [vmem:[#allocation2 + $0x3e4] ss:$16 sps:$4 sm:$0xff]  }
 0x10b   :  { %1067 = vmatprep.mubr.bf16.mxu0 %v203_v38  ;;  %1149 = vmatprep.mubr.bf16.mxu1 %v203_v38  ;;  %v190_v10 = vadd.f32 %v3469_v23, %v81_v32  ;;  %v3055_v38 = vld [vmem:[#allocation2 + $0x3ec] ss:$16 sps:$4 sm:$0xff]   ;;  %v3058_v12 = vld [vmem:[#allocation5 + $0x4] ss:$16 sps:$4 sm:$0xff]  }
 0x10c   :  { %v3064_v23 = vld [vmem:[#allocation5 + $0x24] ss:$16 sps:$4 sm:$0xff]  }
 0x10d   :  { %1038 = vmatpush1.bf16.msra.mxu0 %v2966_v39  ;;  %1120 = vmatpush1.bf16.msra.mxu1 %v2969_v40  ;;  %v3050_v39 = vld [vmem:[#allocation2 + $0x3e0] ss:$16 sps:$4 sm:$0xff]   ;;  %v3053_v40 = vld [vmem:[#allocation2 + $0x3e8] ss:$16 sps:$4 sm:$0xff]   ;;  %v3130_v32 = vld [vmem:[#allocation5 + $0x184] ss:$16 sps:$4 sm:$0xff]  }
 0x10e   :  { %1039 = vmatprep.subr.bf16.mxu0 %v2974_v41  ;;  %1121 = vmatprep.subr.bf16.mxu1 %v2977_v42  ;;  %v198_v41 = vmax.f32 %v190_v10, 0.0  ;;  %v3061_v42 = vld [vmem:[#allocation5 + $0xc] ss:$16 sps:$4 sm:$0xff]  }
 0x10f   :  { %v3139_v10 = vld [vmem:[#allocation5 + $0x1ac] ss:$16 sps:$4 sm:$0xff]  }
 0x111   :  { %1040 = vmatpush1.bf16.msra.mxu0 %v2972_v43  ;;  %1122 = vmatpush1.bf16.msra.mxu1 %v2975_v44  ;;  %v3056_v43 = vld [vmem:[#allocation5] ss:$16 sps:$4 sm:$0xff]   ;;  %v3059_v44 = vld [vmem:[#allocation5 + $0x8] ss:$16 sps:$4 sm:$0xff]  }
 0x112   :  { %1041 = vmatprep.subr.bf16.mxu0 %v2980_v45  ;;  %1123 = vmatprep.subr.bf16.mxu1 %v2983_v46  ;;  %v202_v45 = vpack.c.bf16 %v198_v41, %v198_v41  ;;  %v3067_v46 = vld [vmem:[#allocation5 + $0x2c] ss:$16 sps:$4 sm:$0xff]   ;;  %v3140_v41 = vld [vmem:[#allocation5 + $0x1c0] ss:$16 sps:$4 sm:$0xff]  }
 0x115   :  { %1042 = vmatpush1.bf16.msra.mxu0 %v2978_v47  ;;  %1124 = vmatpush1.bf16.msra.mxu1 %v2981_v48  ;;  %v3062_v47 = vld [vmem:[#allocation5 + $0x20] ss:$16 sps:$4 sm:$0xff]   ;;  %v3065_v48 = vld [vmem:[#allocation5 + $0x28] ss:$16 sps:$4 sm:$0xff]  }
 0x116   :  { %1043 = vmatprep.subr.bf16.mxu0 %v2986_v49  ;;  %1125 = vmatprep.subr.bf16.mxu1 %v2989_v50  ;;  %v3070_v49 = vld [vmem:[#allocation5 + $0x44] ss:$16 sps:$4 sm:$0xff]   ;;  %v3073_v50 = vld [vmem:[#allocation5 + $0x4c] ss:$16 sps:$4 sm:$0xff]  }
 0x119   :  { %1044 = vmatpush1.bf16.msra.mxu0 %v2984_v51  ;;  %1126 = vmatpush1.bf16.msra.mxu1 %v2987_v52  ;;  %v3068_v51 = vld [vmem:[#allocation5 + $0x40] ss:$16 sps:$4 sm:$0xff]   ;;  %v3071_v52 = vld [vmem:[#allocation5 + $0x48] ss:$16 sps:$4 sm:$0xff]  }
 0x11a   :  { %1045 = vmatprep.subr.bf16.mxu0 %v2992_v53  ;;  %1127 = vmatprep.subr.bf16.mxu1 %v2995_v54  ;;  %v3076_v53 = vld [vmem:[#allocation5 + $0x64] ss:$16 sps:$4 sm:$0xff]   ;;  %v3079_v54 = vld [vmem:[#allocation5 + $0x6c] ss:$16 sps:$4 sm:$0xff]  }
 0x11d   :  { %1046 = vmatpush1.bf16.msra.mxu0 %v2990_v55  ;;  %1128 = vmatpush1.bf16.msra.mxu1 %v2993_v56  ;;  %v3074_v55 = vld [vmem:[#allocation5 + $0x60] ss:$16 sps:$4 sm:$0xff]   ;;  %v3077_v56 = vld [vmem:[#allocation5 + $0x68] ss:$16 sps:$4 sm:$0xff]  }
 0x11e   :  { %1047 = vmatprep.subr.bf16.mxu0 %v2998_v57  ;;  %1129 = vmatprep.subr.bf16.mxu1 %v3001_v58  ;;  %v3082_v57 = vld [vmem:[#allocation5 + $0x84] ss:$16 sps:$4 sm:$0xff]   ;;  %v3085_v58 = vld [vmem:[#allocation5 + $0x8c] ss:$16 sps:$4 sm:$0xff]  }
 0x121   :  { %1048 = vmatpush1.bf16.msra.mxu0 %v2996_v59  ;;  %1130 = vmatpush1.bf16.msra.mxu1 %v2999_v60  ;;  %v3080_v59 = vld [vmem:[#allocation5 + $0x80] ss:$16 sps:$4 sm:$0xff]   ;;  %v3083_v60 = vld [vmem:[#allocation5 + $0x88] ss:$16 sps:$4 sm:$0xff]  }
 0x122   :  { %1049 = vmatprep.subr.bf16.mxu0 %v3004_v61  ;;  %1131 = vmatprep.subr.bf16.mxu1 %v3007_v62  ;;  %v3088_v61 = vld [vmem:[#allocation5 + $0xa4] ss:$16 sps:$4 sm:$0xff]   ;;  %v3091_v62 = vld [vmem:[#allocation5 + $0xac] ss:$16 sps:$4 sm:$0xff]  }
 0x125   :  { %1050 = vmatpush1.bf16.msra.mxu0 %v3002_v63  ;;  %1132 = vmatpush1.bf16.msra.mxu1 %v3005_v0  ;;  %v3086_v63 = vld [vmem:[#allocation5 + $0xa0] ss:$16 sps:$4 sm:$0xff]   ;;  %v3089_v0 = vld [vmem:[#allocation5 + $0xa8] ss:$16 sps:$4 sm:$0xff]  }
 0x126   :  { %1051 = vmatprep.subr.bf16.mxu0 %v3010_v1  ;;  %1133 = vmatprep.subr.bf16.mxu1 %v3013_v2  ;;  %v3094_v1 = vld [vmem:[#allocation5 + $0xc4] ss:$16 sps:$4 sm:$0xff]   ;;  %v3097_v2 = vld [vmem:[#allocation5 + $0xcc] ss:$16 sps:$4 sm:$0xff]  }
 0x129   :  { %1052 = vmatpush1.bf16.msra.mxu0 %v3008_v3  ;;  %1134 = vmatpush1.bf16.msra.mxu1 %v3011_v4  ;;  %v3092_v3 = vld [vmem:[#allocation5 + $0xc0] ss:$16 sps:$4 sm:$0xff]   ;;  %v3095_v4 = vld [vmem:[#allocation5 + $0xc8] ss:$16 sps:$4 sm:$0xff]  }
 0x12a   :  { %1053 = vmatprep.subr.bf16.mxu0 %v3016_v5  ;;  %1135 = vmatprep.subr.bf16.mxu1 %v3019_v6  ;;  %v3100_v5 = vld [vmem:[#allocation5 + $0xe4] ss:$16 sps:$4 sm:$0xff]   ;;  %v3103_v6 = vld [vmem:[#allocation5 + $0xec] ss:$16 sps:$4 sm:$0xff]  }
 0x12d   :  { %1054 = vmatpush1.bf16.msra.mxu0 %v3014_v7  ;;  %1136 = vmatpush1.bf16.msra.mxu1 %v3017_v8  ;;  %v3098_v7 = vld [vmem:[#allocation5 + $0xe0] ss:$16 sps:$4 sm:$0xff]   ;;  %v3101_v8 = vld [vmem:[#allocation5 + $0xe8] ss:$16 sps:$4 sm:$0xff]  }
 0x12e   :  { %1055 = vmatprep.subr.bf16.mxu0 %v3022_v9  ;;  %1137 = vmatprep.subr.bf16.mxu1 %v3025_v15  ;;  %v3106_v9 = vld [vmem:[#allocation5 + $0x104] ss:$16 sps:$4 sm:$0xff]   ;;  %v3109_v15 = vld [vmem:[#allocation5 + $0x10c] ss:$16 sps:$4 sm:$0xff]  }
 0x131   :  { %1056 = vmatpush1.bf16.msra.mxu0 %v3020_v16  ;;  %1138 = vmatpush1.bf16.msra.mxu1 %v3023_v17  ;;  %v3104_v16 = vld [vmem:[#allocation5 + $0x100] ss:$16 sps:$4 sm:$0xff]   ;;  %v3107_v17 = vld [vmem:[#allocation5 + $0x108] ss:$16 sps:$4 sm:$0xff]  }
 0x132   :  { %1057 = vmatprep.subr.bf16.mxu0 %v3028_v18  ;;  %1139 = vmatprep.subr.bf16.mxu1 %v3031_v19  ;;  %v3112_v18 = vld [vmem:[#allocation5 + $0x124] ss:$16 sps:$4 sm:$0xff]   ;;  %v3115_v19 = vld [vmem:[#allocation5 + $0x12c] ss:$16 sps:$4 sm:$0xff]  }
 0x135   :  { %1058 = vmatpush1.bf16.msra.mxu0 %v3026_v20  ;;  %1140 = vmatpush1.bf16.msra.mxu1 %v3029_v21  ;;  %v3110_v20 = vld [vmem:[#allocation5 + $0x120] ss:$16 sps:$4 sm:$0xff]   ;;  %v3113_v21 = vld [vmem:[#allocation5 + $0x128] ss:$16 sps:$4 sm:$0xff]  }
 0x136   :  { %1059 = vmatprep.subr.bf16.mxu0 %v3034_v22  ;;  %1141 = vmatprep.subr.bf16.mxu1 %v3037_v24  ;;  %v3118_v22 = vld [vmem:[#allocation5 + $0x144] ss:$16 sps:$4 sm:$0xff]   ;;  %v3121_v24 = vld [vmem:[#allocation5 + $0x14c] ss:$16 sps:$4 sm:$0xff]  }
 0x139   :  { %1060 = vmatpush1.bf16.msra.mxu0 %v3032_v25  ;;  %1142 = vmatpush1.bf16.msra.mxu1 %v3035_v26  ;;  %v3116_v25 = vld [vmem:[#allocation5 + $0x140] ss:$16 sps:$4 sm:$0xff]   ;;  %v3119_v26 = vld [vmem:[#allocation5 + $0x148] ss:$16 sps:$4 sm:$0xff]  }
 0x13a   :  { %1061 = vmatprep.subr.bf16.mxu0 %v3040_v28  ;;  %1143 = vmatprep.subr.bf16.mxu1 %v3043_v29  ;;  %v3124_v28 = vld [vmem:[#allocation5 + $0x164] ss:$16 sps:$4 sm:$0xff]   ;;  %v3127_v29 = vld [vmem:[#allocation5 + $0x16c] ss:$16 sps:$4 sm:$0xff]  }
 0x13d   :  { %1062 = vmatpush1.bf16.msra.mxu0 %v3038_v30  ;;  %1144 = vmatpush1.bf16.msra.mxu1 %v3041_v31  ;;  %v3122_v30 = vld [vmem:[#allocation5 + $0x160] ss:$16 sps:$4 sm:$0xff]   ;;  %v3125_v31 = vld [vmem:[#allocation5 + $0x168] ss:$16 sps:$4 sm:$0xff]  }
 0x13e   :  { %1063 = vmatprep.subr.bf16.mxu0 %v3046_v33  ;;  %1145 = vmatprep.subr.bf16.mxu1 %v3049_v34  ;;  %v3133_v33 = vld [vmem:[#allocation5 + $0x18c] ss:$16 sps:$4 sm:$0xff]   ;;  %v3128_v34 = vld [vmem:[#allocation5 + $0x180] ss:$16 sps:$4 sm:$0xff]  }
 0x141   :  { %1064 = vmatpush1.bf16.msra.mxu0 %v3044_v35  ;;  %1146 = vmatpush1.bf16.msra.mxu1 %v3047_v36  ;;  %v3131_v35 = vld [vmem:[#allocation5 + $0x188] ss:$16 sps:$4 sm:$0xff]   ;;  %v3136_v36 = vld [vmem:[#allocation5 + $0x1a4] ss:$16 sps:$4 sm:$0xff]  }
 0x142   :  { %1065 = vmatprep.subr.bf16.mxu0 %v3052_v37  ;;  %1147 = vmatprep.subr.bf16.mxu1 %v3055_v38  ;;  %v3134_v37 = vld [vmem:[#allocation5 + $0x1a0] ss:$16 sps:$4 sm:$0xff]   ;;  %v3137_v38 = vld [vmem:[#allocation5 + $0x1a8] ss:$16 sps:$4 sm:$0xff]  }
 0x145   :  { %1066 = vmatpush1.bf16.msra.mxu0 %v3050_v39  ;;  %1148 = vmatpush1.bf16.msra.mxu1 %v3053_v40  ;;  %v3142_v39 = vld [vmem:[#allocation5 + $0x1c4] ss:$16 sps:$4 sm:$0xff]   ;;  %v3145_v40 = vld [vmem:[#allocation5 + $0x1cc] ss:$16 sps:$4 sm:$0xff]  }
 0x146   :  { %1956 = vmatprep.subr.bf16.mxu0 %v3058_v12  ;;  %2038 = vmatprep.subr.bf16.mxu1 %v3061_v42  ;;  %v3143_v12 = vld [vmem:[#allocation5 + $0x1c8] ss:$16 sps:$4 sm:$0xff]   ;;  %v3148_v42 = vld [vmem:[#allocation5 + $0x1e4] ss:$16 sps:$4 sm:$0xff]  }
 0x148   :  { %1068 = vmatmul.mubr.bf16.vlgmr.msra.gmra.mrb[4].mxu0 %v202_v45  ;;  %1150 = vmatmul.mubr.bf16.vlgmr.msra.gmra.mrb[4].mxu1 %v202_v45  ;;  %v3149_v45 = vld [vmem:[#allocation5 + $0x1e8] ss:$16 sps:$4 sm:$0xff]  }
 0x149   :  { %1957 = vmatpush1.bf16.msra.mxu0 %v3056_v43  ;;  %2039 = vmatpush1.bf16.msra.mxu1 %v3059_v44  ;;  %v3151_v43 = vld [vmem:[#allocation5 + $0x1ec] ss:$16 sps:$4 sm:$0xff]   ;;  %v3146_v44 = vld [vmem:[#allocation5 + $0x1e0] ss:$16 sps:$4 sm:$0xff]  }
 0x14a   :  { %1958 = vmatprep.subr.bf16.mxu0 %v3064_v23  ;;  %2040 = vmatprep.subr.bf16.mxu1 %v3067_v46  ;;  %v3154_v23 = vld [vmem:[#allocation5 + $0x204] ss:$16 sps:$4 sm:$0xff]   ;;  %v3157_v46 = vld [vmem:[#allocation5 + $0x20c] ss:$16 sps:$4 sm:$0xff]  }
 0x14d   :  { %1959 = vmatpush1.bf16.msra.mxu0 %v3062_v47  ;;  %2041 = vmatpush1.bf16.msra.mxu1 %v3065_v48  ;;  %v3480_v47 = vld [vmem:[%s3615_s4] sm:$0xf] }
 0x14e   :  { %1960 = vmatprep.subr.bf16.mxu0 %v3070_v49  ;;  %2042 = vmatprep.subr.bf16.mxu1 %v3073_v50  ;;  %v337_v48 = vrot.slane %v3480_v47, %v3450_v11  ;;  %v341_v49 = vrot.slane %v3480_v47, %v3458_v13  ;;  %v349_v50 = vrot.slane %v3480_v47, %v3461_v14 }
 0x151   :  { %1961 = vmatpush1.bf16.msra.mxu0 %v3068_v51  ;;  %2043 = vmatpush1.bf16.msra.mxu1 %v3071_v52 }
 0x152   :  { %1962 = vmatprep.subr.bf16.mxu0 %v3076_v53  ;;  %2044 = vmatprep.subr.bf16.mxu1 %v3079_v54 }
 0x155   :  { %1963 = vmatpush1.bf16.msra.mxu0 %v3074_v55  ;;  %2045 = vmatpush1.bf16.msra.mxu1 %v3077_v56 }
 0x156   :  { %1964 = vmatprep.subr.bf16.mxu0 %v3082_v57  ;;  %2046 = vmatprep.subr.bf16.mxu1 %v3085_v58 }
 0x159   :  { %1965 = vmatpush1.bf16.msra.mxu0 %v3080_v59  ;;  %2047 = vmatpush1.bf16.msra.mxu1 %v3083_v60 }
 0x15a   :  { %1966 = vmatprep.subr.bf16.mxu0 %v3088_v61  ;;  %2048 = vmatprep.subr.bf16.mxu1 %v3091_v62 }
 0x15d   :  { %1967 = vmatpush1.bf16.msra.mxu0 %v3086_v63  ;;  %2049 = vmatpush1.bf16.msra.mxu1 %v3089_v0 }
 0x15e   :  { %1968 = vmatprep.subr.bf16.mxu0 %v3094_v1  ;;  %2050 = vmatprep.subr.bf16.mxu1 %v3097_v2  ;;  %v3152_v2 = vld [vmem:[#allocation5 + $0x200] ss:$16 sps:$4 sm:$0xff]  }
 0x161   :  { %1969 = vmatpush1.bf16.msra.mxu0 %v3092_v3  ;;  %2051 = vmatpush1.bf16.msra.mxu1 %v3095_v4  ;;  %v3155_v3 = vld [vmem:[#allocation5 + $0x208] ss:$16 sps:$4 sm:$0xff]  }
 0x162   :  { %1970 = vmatprep.subr.bf16.mxu0 %v3100_v5  ;;  %2052 = vmatprep.subr.bf16.mxu1 %v3103_v6  ;;  %v3160_v5 = vld [vmem:[#allocation5 + $0x224] ss:$16 sps:$4 sm:$0xff]   ;;  %v3163_v6 = vld [vmem:[#allocation5 + $0x22c] ss:$16 sps:$4 sm:$0xff]  }
 0x165   :  { %1971 = vmatpush1.bf16.msra.mxu0 %v3098_v7  ;;  %2053 = vmatpush1.bf16.msra.mxu1 %v3101_v8  ;;  %v3158_v8 = vld [vmem:[#allocation5 + $0x220] ss:$16 sps:$4 sm:$0xff]  }
 0x166   :  { %1972 = vmatprep.subr.bf16.mxu0 %v3106_v9  ;;  %2054 = vmatprep.subr.bf16.mxu1 %v3109_v15  ;;  %v3161_v9 = vld [vmem:[#allocation5 + $0x228] ss:$16 sps:$4 sm:$0xff]   ;;  %v3166_v15 = vld [vmem:[#allocation5 + $0x244] ss:$16 sps:$4 sm:$0xff]  }
 0x169   :  { %1973 = vmatpush1.bf16.msra.mxu0 %v3104_v16  ;;  %2055 = vmatpush1.bf16.msra.mxu1 %v3107_v17  ;;  %v3169_v16 = vld [vmem:[#allocation5 + $0x24c] ss:$16 sps:$4 sm:$0xff]   ;;  %v3164_v17 = vld [vmem:[#allocation5 + $0x240] ss:$16 sps:$4 sm:$0xff]  }
 0x16a   :  { %1974 = vmatprep.subr.bf16.mxu0 %v3112_v18  ;;  %2056 = vmatprep.subr.bf16.mxu1 %v3115_v19  ;;  %v3167_v18 = vld [vmem:[#allocation5 + $0x248] ss:$16 sps:$4 sm:$0xff]   ;;  %v3172_v19 = vld [vmem:[#allocation5 + $0x264] ss:$16 sps:$4 sm:$0xff]  }
 0x16d   :  { %1975 = vmatpush1.bf16.msra.mxu0 %v3110_v20  ;;  %2057 = vmatpush1.bf16.msra.mxu1 %v3113_v21  ;;  %v3175_v20 = vld [vmem:[#allocation5 + $0x26c] ss:$16 sps:$4 sm:$0xff]   ;;  %v3170_v21 = vld [vmem:[#allocation5 + $0x260] ss:$16 sps:$4 sm:$0xff]  }
 0x16e   :  { %1976 = vmatprep.subr.bf16.mxu0 %v3118_v22  ;;  %2058 = vmatprep.subr.bf16.mxu1 %v3121_v24  ;;  %v3173_v22 = vld [vmem:[#allocation5 + $0x268] ss:$16 sps:$4 sm:$0xff]   ;;  %v3178_v24 = vld [vmem:[#allocation5 + $0x284] ss:$16 sps:$4 sm:$0xff]  }
 0x171   :  { %1977 = vmatpush1.bf16.msra.mxu0 %v3116_v25  ;;  %2059 = vmatpush1.bf16.msra.mxu1 %v3119_v26  ;;  %v3181_v25 = vld [vmem:[#allocation5 + $0x28c] ss:$16 sps:$4 sm:$0xff]   ;;  %v3176_v26 = vld [vmem:[#allocation5 + $0x280] ss:$16 sps:$4 sm:$0xff]  }
 0x172   :  { %1978 = vmatprep.subr.bf16.mxu0 %v3124_v28  ;;  %2060 = vmatprep.subr.bf16.mxu1 %v3127_v29  ;;  %v3179_v28 = vld [vmem:[#allocation5 + $0x288] ss:$16 sps:$4 sm:$0xff]   ;;  %v3184_v29 = vld [vmem:[#allocation5 + $0x2a4] ss:$16 sps:$4 sm:$0xff]  }
 0x175   :  { %1979 = vmatpush1.bf16.msra.mxu0 %v3122_v30  ;;  %2061 = vmatpush1.bf16.msra.mxu1 %v3125_v31  ;;  %v3187_v30 = vld [vmem:[#allocation5 + $0x2ac] ss:$16 sps:$4 sm:$0xff]   ;;  %v3182_v31 = vld [vmem:[#allocation5 + $0x2a0] ss:$16 sps:$4 sm:$0xff]  }
 0x176   :  { %1980 = vmatprep.subr.bf16.mxu0 %v3130_v32  ;;  %2062 = vmatprep.subr.bf16.mxu1 %v3133_v33  ;;  %v3185_v32 = vld [vmem:[#allocation5 + $0x2a8] ss:$16 sps:$4 sm:$0xff]   ;;  %v3190_v33 = vld [vmem:[#allocation5 + $0x2c4] ss:$16 sps:$4 sm:$0xff]  }
 0x179   :  { %1981 = vmatpush1.bf16.msra.mxu0 %v3128_v34  ;;  %2063 = vmatpush1.bf16.msra.mxu1 %v3131_v35  ;;  %v3193_v34 = vld [vmem:[#allocation5 + $0x2cc] ss:$16 sps:$4 sm:$0xff]   ;;  %v3188_v35 = vld [vmem:[#allocation5 + $0x2c0] ss:$16 sps:$4 sm:$0xff]  }
 0x17a   :  { %1982 = vmatprep.subr.bf16.mxu0 %v3136_v36  ;;  %2064 = vmatprep.subr.bf16.mxu1 %v3139_v10  ;;  %v3191_v36 = vld [vmem:[#allocation5 + $0x2c8] ss:$16 sps:$4 sm:$0xff]   ;;  %v3196_v10 = vld [vmem:[#allocation5 + $0x2e4] ss:$16 sps:$4 sm:$0xff]  }
 0x17d   :  { %1983 = vmatpush1.bf16.msra.mxu0 %v3134_v37  ;;  %2065 = vmatpush1.bf16.msra.mxu1 %v3137_v38  ;;  %v3199_v37 = vld [vmem:[#allocation5 + $0x2ec] ss:$16 sps:$4 sm:$0xff]   ;;  %v3194_v38 = vld [vmem:[#allocation5 + $0x2e0] ss:$16 sps:$4 sm:$0xff]  }
 0x17e   :  { %1984 = vmatprep.subr.bf16.mxu0 %v3142_v39  ;;  %2066 = vmatprep.subr.bf16.mxu1 %v3145_v40  ;;  %v3197_v39 = vld [vmem:[#allocation5 + $0x2e8] ss:$16 sps:$4 sm:$0xff]   ;;  %v3202_v40 = vld [vmem:[#allocation5 + $0x304] ss:$16 sps:$4 sm:$0xff]  }
 0x181   :  { %1985 = vmatpush1.bf16.msra.mxu0 %v3140_v41  ;;  %2067 = vmatpush1.bf16.msra.mxu1 %v3143_v12  ;;  %v3205_v41 = vld [vmem:[#allocation5 + $0x30c] ss:$16 sps:$4 sm:$0xff]   ;;  %v3200_v12 = vld [vmem:[#allocation5 + $0x300] ss:$16 sps:$4 sm:$0xff]  }
 0x182   :  { %1986 = vmatprep.subr.bf16.mxu0 %v3148_v42  ;;  %2068 = vmatprep.subr.bf16.mxu1 %v3151_v43  ;;  %v3203_v42 = vld [vmem:[#allocation5 + $0x308] ss:$16 sps:$4 sm:$0xff]   ;;  %v3208_v43 = vld [vmem:[#allocation5 + $0x324] ss:$16 sps:$4 sm:$0xff]  }
 0x185   :  { %1987 = vmatpush1.bf16.msra.mxu0 %v3146_v44  ;;  %2069 = vmatpush1.bf16.msra.mxu1 %v3149_v45  ;;  %v3211_v44 = vld [vmem:[#allocation5 + $0x32c] ss:$16 sps:$4 sm:$0xff]   ;;  %v3206_v45 = vld [vmem:[#allocation5 + $0x320] ss:$16 sps:$4 sm:$0xff]  }
 0x186   :  { %1997 = vmatprep.subr.bf16.mxu0 %v3154_v23  ;;  %2079 = vmatprep.subr.bf16.mxu1 %v3157_v46  ;;  %v3209_v23 = vld [vmem:[#allocation5 + $0x328] ss:$16 sps:$4 sm:$0xff]   ;;  %v3214_v46 = vld [vmem:[#allocation5 + $0x344] ss:$16 sps:$4 sm:$0xff]  }
 0x21b   :  { %v1069_v51 = vpop.f32.mrb[4].mxu0  ;;  %v3488_v52 = vpop.f32.mrb[4].mxu1 }
 0x21c   :  { %v2828_v53 = vadd.f32 %v1069_v51, %v337_v48  ;;  %v1071_v54 = vpop.f32.mrb[5].mxu0  ;;  %v1153_v55 = vpop.f32.mrb[5].mxu1  ;;  %v3217_v48 = vld [vmem:[#allocation5 + $0x34c] ss:$16 sps:$4 sm:$0xff]   ;;  %v3220_v51 = vld [vmem:[#allocation5 + $0x364] ss:$16 sps:$4 sm:$0xff]  }
 0x21d   :  { %v2829_v56 = vadd.f32 %v1071_v54, %v341_v49  ;;  %v2831_v57 = vadd.f32 %v1153_v55, %v349_v50  ;;  %v1073_v58 = vpop.f32.mrb[6].mxu0  ;;  %v1155_v59 = vpop.f32.mrb[6].mxu1  ;;  %v3212_v49 = vld [vmem:[#allocation5 + $0x340] ss:$16 sps:$4 sm:$0xff]   ;;  %v3215_v50 = vld [vmem:[#allocation5 + $0x348] ss:$16 sps:$4 sm:$0xff]  }
 0x21e   :  { %v1158_v60 = vmax.f32 %v2828_v53, 0.0  ;;  %v1074_v61 = vpop.f32.mrb[7].mxu0  ;;  %v1156_v62 = vpop.f32.mrb[7].mxu1  ;;  %v3223_v53 = vld [vmem:[#allocation5 + $0x36c] ss:$16 sps:$4 sm:$0xff]  }
 0x21f   :  { %v1159_v63 = vmax.f32 %v2829_v56, 0.0  ;;  %v1161_v0 = vmax.f32 %v2831_v57, 0.0  ;;  %v3218_v54 = vld [vmem:[#allocation5 + $0x360] ss:$16 sps:$4 sm:$0xff]   ;;  %v3221_v55 = vld [vmem:[#allocation5 + $0x368] ss:$16 sps:$4 sm:$0xff]  }
 0x220   :  { %v1162_v4 = vpack.c.bf16 %v1158_v60, %v1158_v60  ;;  %v3226_v56 = vld [vmem:[#allocation5 + $0x384] ss:$16 sps:$4 sm:$0xff]   ;;  %v3229_v57 = vld [vmem:[#allocation5 + $0x38c] ss:$16 sps:$4 sm:$0xff]   ;;  %v3224_v58 = vld [vmem:[#allocation5 + $0x380] ss:$16 sps:$4 sm:$0xff]  }
 0x221   :  { %v1163_v1 = vpack.c.bf16 %v1159_v63, %v1159_v63  ;;  %v1165_v7 = vpack.c.bf16 %v1161_v0, %v1161_v0  ;;  %v3227_v59 = vld [vmem:[#allocation5 + $0x388] ss:$16 sps:$4 sm:$0xff]   ;;  %v3232_v60 = vld [vmem:[#allocation5 + $0x3a4] ss:$16 sps:$4 sm:$0xff]   ;;  %v3235_v61 = vld [vmem:[#allocation5 + $0x3ac] ss:$16 sps:$4 sm:$0xff]   ;;  %v345_v0 = vrot.slane %v3480_v47, %v3472_v27 }
 0x222   :  { %v3230_v62 = vld [vmem:[#allocation5 + $0x3a0] ss:$16 sps:$4 sm:$0xff]   ;;  %v3233_v63 = vld [vmem:[#allocation5 + $0x3a8] ss:$16 sps:$4 sm:$0xff]  }
 0x223   :  { %1988 = vmatprep.mubr.bf16.mxu0 %v1163_v1  ;;  %2070 = vmatprep.mubr.bf16.mxu1 %v1163_v1  ;;  %v3238_v1 = vld [vmem:[#allocation5 + $0x3c4] ss:$16 sps:$4 sm:$0xff]  }
 0x224   :  { %1989 = vmatmul.mubr.bf16.vlgmr.msra.gmra.mrb[8].mxu0 %v1162_v4  ;;  %2071 = vmatmul.mubr.bf16.vlgmr.msra.gmra.mrb[8].mxu1 %v1162_v4  ;;  %v3239_v4 = vld [vmem:[#allocation5 + $0x3c8] ss:$16 sps:$4 sm:$0xff]   ;;  %v3248_v47 = vld [vmem:[%s3618_s7 + $0x40] sm:$0xff]  }
 0x225   :  { %1998 = vmatpush1.bf16.msra.mxu0 %v3152_v2  ;;  %2080 = vmatpush1.bf16.msra.mxu1 %v3155_v3  ;;  %v3241_v2 = vld [vmem:[#allocation5 + $0x3cc] ss:$16 sps:$4 sm:$0xff]   ;;  %v3236_v3 = vld [vmem:[#allocation5 + $0x3c0] ss:$16 sps:$4 sm:$0xff]  }
 0x226   :  { %2029 = vmatprep.mubr.bf16.mxu0 %v1165_v7  ;;  %2111 = vmatprep.mubr.bf16.mxu1 %v1165_v7  ;;  %v3247_v7 = vld [vmem:[#allocation5 + $0x3ec] ss:$16 sps:$4 sm:$0xff]  }
 0x227   :  { %1999 = vmatprep.subr.bf16.mxu0 %v3160_v5  ;;  %2081 = vmatprep.subr.bf16.mxu1 %v3163_v6  ;;  %v2830_v5 = vadd.f32 %v3488_v52, %v345_v0  ;;  %v3244_v6 = vld [vmem:[#allocation5 + $0x3e4] ss:$16 sps:$4 sm:$0xff]  }
 0x228   :  { %v3250_v52 = vld [vmem:[%s3618_s7] sm:$0xff]  }
 0x229   :  { %2000 = vmatpush1.bf16.msra.mxu0 %v3158_v8  ;;  %2082 = vmatpush1.bf16.msra.mxu1 %v3161_v9  ;;  %v3242_v8 = vld [vmem:[#allocation5 + $0x3e0] ss:$16 sps:$4 sm:$0xff]   ;;  %v3245_v9 = vld [vmem:[#allocation5 + $0x3e8] ss:$16 sps:$4 sm:$0xff]  }
 0x22a   :  { %2001 = vmatprep.subr.bf16.mxu0 %v3166_v15  ;;  %2083 = vmatprep.subr.bf16.mxu1 %v3169_v16  ;;  %v1160_v15 = vmax.f32 %v2830_v5, 0.0  ;;  %v3249_v16 = vld [vmem:[%s3618_s7 + $0xc0] sm:$0xff]  }
 0x22d   :  { %2002 = vmatpush1.bf16.msra.mxu0 %v3164_v17  ;;  %2084 = vmatpush1.bf16.msra.mxu1 %v3167_v18  ;;  %v3251_v17 = vld [vmem:[%s3618_s7 + $0x80] sm:$0xff]   ;;  %v1164_v18 = vpack.c.bf16 %v1160_v15, %v1160_v15 }
 0x22e   :  { %2003 = vmatprep.subr.bf16.mxu0 %v3172_v19  ;;  %2085 = vmatprep.subr.bf16.mxu1 %v3175_v20  ;;  %v3252_v19 = vld [vmem:[%s3618_s7 + $0x48] sm:$0xff]  }
 0x22f   :  { %v3253_v20 = vld [vmem:[%s3618_s7 + $0xc8] sm:$0xff]  }
 0x231   :  { %2004 = vmatpush1.bf16.msra.mxu0 %v3170_v21  ;;  %2086 = vmatpush1.bf16.msra.mxu1 %v3173_v22  ;;  %v3254_v21 = vld [vmem:[%s3618_s7 + $0x8] sm:$0xff]  }
 0x232   :  { %2005 = vmatprep.subr.bf16.mxu0 %v3178_v24  ;;  %2087 = vmatprep.subr.bf16.mxu1 %v3181_v25  ;;  %v3255_v22 = vld [vmem:[%s3618_s7 + $0x88] sm:$0xff]   ;;  %v3256_v24 = vld [vmem:[%s3618_s7 + $0x50] sm:$0xff]  }
 0x233   :  { %v3257_v25 = vld [vmem:[%s3618_s7 + $0xd0] sm:$0xff]  }
 0x235   :  { %2006 = vmatpush1.bf16.msra.mxu0 %v3176_v26  ;;  %2088 = vmatpush1.bf16.msra.mxu1 %v3179_v28  ;;  %v3258_v26 = vld [vmem:[%s3618_s7 + $0x10] sm:$0xff]  }
 0x236   :  { %2007 = vmatprep.subr.bf16.mxu0 %v3184_v29  ;;  %2089 = vmatprep.subr.bf16.mxu1 %v3187_v30  ;;  %v3259_v28 = vld [vmem:[%s3618_s7 + $0x90] sm:$0xff]   ;;  %v3260_v29 = vld [vmem:[%s3618_s7 + $0x58] sm:$0xff]  }
 0x237   :  { %v3261_v30 = vld [vmem:[%s3618_s7 + $0xd8] sm:$0xff]  }
 0x239   :  { %2008 = vmatpush1.bf16.msra.mxu0 %v3182_v31  ;;  %2090 = vmatpush1.bf16.msra.mxu1 %v3185_v32  ;;  %v3262_v31 = vld [vmem:[%s3618_s7 + $0x18] sm:$0xff]  }
 0x23a   :  { %2009 = vmatprep.subr.bf16.mxu0 %v3190_v33  ;;  %2091 = vmatprep.subr.bf16.mxu1 %v3193_v34  ;;  %v3263_v32 = vld [vmem:[%s3618_s7 + $0x98] sm:$0xff]   ;;  %v3264_v33 = vld [vmem:[%s3618_s7 + $0x60] sm:$0xff]  }
 0x23b   :  { %v3265_v34 = vld [vmem:[%s3618_s7 + $0xe0] sm:$0xff]  }
 0x23d   :  { %2010 = vmatpush1.bf16.msra.mxu0 %v3188_v35  ;;  %2092 = vmatpush1.bf16.msra.mxu1 %v3191_v36  ;;  %v3266_v35 = vld [vmem:[%s3618_s7 + $0x20] sm:$0xff]  }
 0x23e   :  { %2011 = vmatprep.subr.bf16.mxu0 %v3196_v10  ;;  %2093 = vmatprep.subr.bf16.mxu1 %v3199_v37  ;;  %v3267_v36 = vld [vmem:[%s3618_s7 + $0xa0] sm:$0xff]   ;;  %v3268_v10 = vld [vmem:[%s3618_s7 + $0x68] sm:$0xff]  }
 0x23f   :  { %v3269_v37 = vld [vmem:[%s3618_s7 + $0xe8] sm:$0xff]  }
 0x241   :  { %2012 = vmatpush1.bf16.msra.mxu0 %v3194_v38  ;;  %2094 = vmatpush1.bf16.msra.mxu1 %v3197_v39  ;;  %v3270_v38 = vld [vmem:[%s3618_s7 + $0x28] sm:$0xff]  }
 0x242   :  { %2013 = vmatprep.subr.bf16.mxu0 %v3202_v40  ;;  %2095 = vmatprep.subr.bf16.mxu1 %v3205_v41  ;;  %v3271_v39 = vld [vmem:[%s3618_s7 + $0xa8] sm:$0xff]   ;;  %v3272_v40 = vld [vmem:[%s3618_s7 + $0x70] sm:$0xff]  }
 0x243   :  { %v3273_v41 = vld [vmem:[%s3618_s7 + $0xf0] sm:$0xff]  }
 0x245   :  { %2014 = vmatpush1.bf16.msra.mxu0 %v3200_v12  ;;  %2096 = vmatpush1.bf16.msra.mxu1 %v3203_v42  ;;  %v3274_v12 = vld [vmem:[%s3618_s7 + $0x30] sm:$0xff]  }
 0x246   :  { %2015 = vmatprep.subr.bf16.mxu0 %v3208_v43  ;;  %2097 = vmatprep.subr.bf16.mxu1 %v3211_v44  ;;  %v3275_v42 = vld [vmem:[%s3618_s7 + $0xb0] sm:$0xff]   ;;  %v3276_v43 = vld [vmem:[%s3618_s7 + $0x78] sm:$0xff]  }
 0x247   :  { %v3277_v44 = vld [vmem:[%s3618_s7 + $0xf8] sm:$0xff]  }
 0x249   :  { %2016 = vmatpush1.bf16.msra.mxu0 %v3206_v45  ;;  %2098 = vmatpush1.bf16.msra.mxu1 %v3209_v23  ;;  %v3278_v45 = vld [vmem:[%s3618_s7 + $0x38] sm:$0xff]  }
 0x24a   :  { %2017 = vmatprep.subr.bf16.mxu0 %v3214_v46  ;;  %2099 = vmatprep.subr.bf16.mxu1 %v3217_v48  ;;  %v3279_v23 = vld [vmem:[%s3618_s7 + $0xb8] sm:$0xff]   ;;  %v1294_v46 = vld [vmem:[%s3617_s6] sm:$0xf] }
 0x24b   :  { %v1299_v48 = vrot.slane %v1294_v46, %v3450_v11 }
 0x24d   :  { %2018 = vmatpush1.bf16.msra.mxu0 %v3212_v49  ;;  %2100 = vmatpush1.bf16.msra.mxu1 %v3215_v50  ;;  %v1307_v49 = vrot.slane %v1294_v46, %v3472_v27  ;;  %v1303_v50 = vrot.slane %v1294_v46, %v3458_v13 }
 0x24e   :  { %2019 = vmatprep.subr.bf16.mxu0 %v3220_v51  ;;  %2101 = vmatprep.subr.bf16.mxu1 %v3223_v53  ;;  %v1311_v51 = vrot.slane %v1294_v46, %v3461_v14 }
 0x251   :  { %2020 = vmatpush1.bf16.msra.mxu0 %v3218_v54  ;;  %2102 = vmatpush1.bf16.msra.mxu1 %v3221_v55 }
 0x252   :  { %2021 = vmatprep.subr.bf16.mxu0 %v3226_v56  ;;  %2103 = vmatprep.subr.bf16.mxu1 %v3229_v57 }
 0x255   :  { %2022 = vmatpush1.bf16.msra.mxu0 %v3224_v58  ;;  %2104 = vmatpush1.bf16.msra.mxu1 %v3227_v59 }
 0x256   :  { %2023 = vmatprep.subr.bf16.mxu0 %v3232_v60  ;;  %2105 = vmatprep.subr.bf16.mxu1 %v3235_v61 }
 0x259   :  { %2024 = vmatpush1.bf16.msra.mxu0 %v3230_v62  ;;  %2106 = vmatpush1.bf16.msra.mxu1 %v3233_v63 }
 0x25a   :  { %2025 = vmatprep.subr.bf16.mxu0 %v3238_v1  ;;  %2107 = vmatprep.subr.bf16.mxu1 %v3241_v2 }
 0x25d   :  { %2026 = vmatpush1.bf16.msra.mxu0 %v3236_v3  ;;  %2108 = vmatpush1.bf16.msra.mxu1 %v3239_v4 }
 0x25e   :  { %2027 = vmatprep.subr.bf16.mxu0 %v3244_v6  ;;  %2109 = vmatprep.subr.bf16.mxu1 %v3247_v7  ;;  %v2751_v7 = vld [vmem:[%s3619_s8] ss:$0 sm:$0xff] }
 0x261   :  { %2028 = vmatpush1.bf16.msra.mxu0 %v3242_v8  ;;  %2110 = vmatpush1.bf16.msra.mxu1 %v3245_v9 }
 0x262   :  { %2784 = vmatprep.subr.bf16.mxu0 %v3248_v47  ;;  %2806 = vmatprep.subr.bf16.mxu1 %v3249_v16 }
 0x264   :  { %2030 = vmatmul.mubr.bf16.vlgmr.msra.gmra.mrb[8].mxu0 %v1164_v18  ;;  %2112 = vmatmul.mubr.bf16.vlgmr.msra.gmra.mrb[8].mxu1 %v1164_v18 }
 0x265   :  { %2785 = vmatpush3.bf16.msra.mxu0 %v3250_v52  ;;  %2807 = vmatpush3.bf16.msra.mxu1 %v3251_v17 }
 0x266   :  { %2786 = vmatprep.subr.bf16.mxu0 %v3252_v19  ;;  %2808 = vmatprep.subr.bf16.mxu1 %v3253_v20 }
 0x269   :  { %2787 = vmatpush3.bf16.msra.mxu0 %v3254_v21  ;;  %2809 = vmatpush3.bf16.msra.mxu1 %v3255_v22 }
 0x26a   :  { %2788 = vmatprep.subr.bf16.mxu0 %v3256_v24  ;;  %2810 = vmatprep.subr.bf16.mxu1 %v3257_v25 }
 0x26d   :  { %2789 = vmatpush3.bf16.msra.mxu0 %v3258_v26  ;;  %2811 = vmatpush3.bf16.msra.mxu1 %v3259_v28 }
 0x26e   :  { %2790 = vmatprep.subr.bf16.mxu0 %v3260_v29  ;;  %2812 = vmatprep.subr.bf16.mxu1 %v3261_v30 }
 0x271   :  { %2791 = vmatpush3.bf16.msra.mxu0 %v3262_v31  ;;  %2813 = vmatpush3.bf16.msra.mxu1 %v3263_v32 }
 0x272   :  { %2792 = vmatprep.subr.bf16.mxu0 %v3264_v33  ;;  %2814 = vmatprep.subr.bf16.mxu1 %v3265_v34 }
 0x275   :  { %2793 = vmatpush3.bf16.msra.mxu0 %v3266_v35  ;;  %2815 = vmatpush3.bf16.msra.mxu1 %v3267_v36 }
 0x276   :  { %2794 = vmatprep.subr.bf16.mxu0 %v3268_v10  ;;  %2816 = vmatprep.subr.bf16.mxu1 %v3269_v37 }
 0x279   :  { %2795 = vmatpush3.bf16.msra.mxu0 %v3270_v38  ;;  %2817 = vmatpush3.bf16.msra.mxu1 %v3271_v39 }
 0x27a   :  { %2796 = vmatprep.subr.bf16.mxu0 %v3272_v40  ;;  %2818 = vmatprep.subr.bf16.mxu1 %v3273_v41 }
 0x27d   :  { %2797 = vmatpush3.bf16.msra.mxu0 %v3274_v12  ;;  %2819 = vmatpush3.bf16.msra.mxu1 %v3275_v42 }
 0x27e   :  { %2798 = vmatprep.subr.bf16.mxu0 %v3276_v43  ;;  %2820 = vmatprep.subr.bf16.mxu1 %v3277_v44 }
 0x281   :  { %2799 = vmatpush3.bf16.msra.mxu0 %v3278_v45  ;;  %2821 = vmatpush3.bf16.msra.mxu1 %v3279_v23 }
 0x337   :  { %v2031_v53 = vpop.f32.mrb[8].mxu0  ;;  %v2113_v54 = vpop.f32.mrb[8].mxu1 }
 0x338   :  { %v2832_v55 = vadd.f32 %v2031_v53, %v1299_v48  ;;  %v2834_v56 = vadd.f32 %v2113_v54, %v1307_v49  ;;  %v2033_v57 = vpop.f32.mrb[9].mxu0  ;;  %v2115_v58 = vpop.f32.mrb[9].mxu1 }
 0x339   :  { %v2833_v59 = vadd.f32 %v2033_v57, %v1303_v50  ;;  %v2835_v60 = vadd.f32 %v2115_v58, %v1311_v51  ;;  %v2035_v61 = vpop.f32.mrb[10].mxu0  ;;  %v2117_v62 = vpop.f32.mrb[10].mxu1 }
 0x33a   :  { %v2120_v63 = vmax.f32 %v2832_v55, 0.0  ;;  %v2122_v0 = vmax.f32 %v2834_v56, 0.0  ;;  %v2036_v1 = vpop.f32.mrb[11].mxu0  ;;  %v2118_v11 = vpop.f32.mrb[11].mxu1 }
 0x33b   :  { %v2121_v2 = vmax.f32 %v2833_v59, 0.0  ;;  %v2123_v27 = vmax.f32 %v2835_v60, 0.0 }
 0x33c   :  { %v2124_v4 = vpack.c.bf16 %v2120_v63, %v2120_v63  ;;  %v2126_v14 = vpack.c.bf16 %v2122_v0, %v2122_v0 }
 0x33d   :  { %v2125_v3 = vpack.c.bf16 %v2121_v2, %v2121_v2  ;;  %v2127_v13 = vpack.c.bf16 %v2123_v27, %v2123_v27 }
 0x33f   :  { %2423 = vmatprep.mubr.bf16.mxu0 %v2125_v3  ;;  %2463 = vmatprep.mubr.bf16.mxu1 %v2127_v13 }
 0x340   :  { %2424 = vmatmul.mubr.bf16.vlgmr.msra.gmra.mrb[12].mxu0 %v2124_v4  ;;  %2464 = vmatmul.mubr.bf16.vlgmr.msra.gmra.mrb[12].mxu1 %v2126_v14 }
 0x413   :  { %v2800_v5 = vpop.f32.mrb[12].mxu0  ;;  %v2822_v6 = vpop.f32.mrb[12].mxu1 }
 0x414   :  { %v2801_v8 = vpop.f32.mrb[13].mxu0  ;;  %v2823_v9 = vpop.f32.mrb[13].mxu1 }
 0x415   :  { %v2802_v15 = vadd.f32 %v2801_v8, %v2800_v5  ;;  %v2824_v47 = vadd.f32 %v2823_v9, %v2822_v6  ;;  %v2803_v16 = vpop.f32.mrb[14].mxu0  ;;  %v2825_v52 = vpop.f32.mrb[14].mxu1 }
 0x416   :  { %v2804_v17 = vpop.f32.mrb[15].mxu0  ;;  %v2826_v18 = vpop.f32.mrb[15].mxu1 }
 0x417   :  { %v2426_v19 = vadd.f32 %v2802_v15, %v2751_v7 }
 0x419   :  { %v2466_v20 = vadd.f32 %v2824_v47, %v2426_v19 }
 0x41b   :  { %2472 = vst.msk [vmem:[#allocation7] sm:$0x3] %vm2471_vm1, %v2466_v20 }
 0x41c   :  { %3335 = shalt.err (!%p3332_p6)
}
 0x41d   :  { %s3336_s16 = scalar_lea.hbm %s3620_s9, 32 }
 0x41e   :  { %p3337_p7 = scmp.ne.s32.totalorder %s3620_s9, %s3336_s16  ;;  %p3340_p8 = scmp.lt.u32.totalorder %s3336_s16, %s3620_s9 }
 0x420   :  { %p3342_p9 = pnand %p3340_p8, %p3337_p7 }
 0x422   :  { %3345 = shalt.err (!%p3342_p9)
}
 0x423   :  { %2482 = dma.vmem_to_hbm [thread:$0]  %s2480_s13, 32, %s3620_s9, [#allocation4]  }
 0x424   :  { %3350 = dma.done.wait [#allocation4], 32  }
 0x425   :  { %3351 = vsyncadd [#allocation4], 4294967264 }
 0x426   :  { %2486 = vsyncpa [#allocation3], 1 }
 0x427   :  { %2487 = vsyncpa [#allocation6], 1 }
 0x428   :  { %2488 = vsyncpa [#allocation4], 1 }

</bundles_post_ra>
